<compile_context>
chip_gen: v5e
topology: v5e:2x2
jax: 0.10.0
libtpu: 0.0.40
codegen_flags: <defaults>
</compile_context>

<pallas_src>
import math
import jax
import jax.numpy as jnp
from jax.experimental import pallas as pl
from jax.experimental.pallas import tpu as pltpu


def make_positional_embedding(d_model, max_len=256):
    """Replicates PositionalEmbedding buffer construction exactly (incl. odd d_model)."""
    position = jnp.arange(max_len, dtype=jnp.float32)[:, None]            # (max_len, 1)
    div_term = jnp.exp(
        jnp.arange(0, d_model, 2, dtype=jnp.float32) * -(math.log(10000.0) / d_model)
    )                                                                     # (ceil(d/2),)
    odd_len = d_model - div_term.shape[0]                                 # floor(d/2)
    pe = jnp.zeros((max_len, d_model), jnp.float32)
    pe = pe.at[:, 0::2].set(jnp.sin(position * div_term))
    pe = pe.at[:, 1::2].set(jnp.cos(position * div_term[:odd_len]))
    return pe                                                             # (max_len, d_model)


def _make_kernel(cat_nums, kcat_pad):
    """One row block: linear MXU dot + fused categorical one-hot dot + (pe + bias)."""
    C = len(cat_nums)
    offsets = []
    off = 0
    for n in cat_nums:
        offsets.append(off)
        off += n

    def kernel(sem_ref, idx_ref, w_ref, tab_ref, peb_ref, out_ref):
        # sem_ref: (TR, E)        bf16 — semantic embedding rows (streamed)
        # idx_ref: (TR, C)        i32  — raw category indices (streamed)
        # w_ref:   (E, H)         bf16 — Linear weight, resident
        # tab_ref: (Kcat_pad, H)  f32  — [table_0 ; ... ; table_{C-1} ; 0-pad], resident
        # peb_ref: (TR, H)        f32  — pe[row % S] + bias, resident (TR % S == 0)
        # out_ref: (TR, H)        f32
        TR = sem_ref.shape[0]

        # Linear(embed_len, H): single MXU dot, bf16 operands, f32 accumulation.
        acc = jnp.dot(sem_ref[...], w_ref[...], preferred_element_type=jnp.float32)

        # Categorical lookups: one-hot built only over the small fused-table depth.
        idx = idx_ref[...]                                            # (TR, C)
        col = jax.lax.broadcasted_iota(jnp.int32, (TR, kcat_pad), 1)
        onehot = jnp.zeros((TR, kcat_pad), jnp.float32)
        for j in range(C):                                            # offsets: Python consts
            ij = idx[:, j:j + 1]                                      # (TR, 1)
            valid = (ij >= 0) & (ij < cat_nums[j])                    # mask invalid / pad rows
            onehot += (valid & (col == ij + offsets[j])).astype(jnp.float32)
        acc = acc + jnp.dot(onehot, tab_ref[...], preferred_element_type=jnp.float32)

        # + positional embedding + bias (folded once in the wrapper).
        out_ref[...] = acc + peb_ref[...]

    return kernel


def input_embedding_forward(segments, semantic_embeds, categories, params, row_block=1024):
    """Pallas implementation of InputEmbedding.forward (eval mode)."""
    B, S, E = semantic_embeds.shape
    C = categories.shape[-1]
    H = params["w"].shape[1]
    cat_nums = [int(t.shape[0]) for t in params["tables"]]
    assert C == len(cat_nums)

    R = B * S

    # Row-block size: multiple of S (so one resident pe+bias tile covers every
    # block identically) and of 8 (sublane granularity).
    unit = math.lcm(S, 8)
    Rp0 = ((R + unit - 1) // unit) * unit
    TR = min(unit * max(1, row_block // unit), Rp0)
    if TR == Rp0 and Rp0 >= 2 * unit:
        # Keep >= 2 blocks so v7x's second TensorCore gets work on the parallel axis.
        TR = (Rp0 // 2) // unit * unit
    Rp = ((Rp0 + TR - 1) // TR) * TR
    n_blocks = Rp // TR

    # Fused categorical table (Kcat_pad, H): tables back-to-back, zero pad to 8-multiple.
    K_cat = sum(cat_nums)
    Kcat_pad = max(8, ((K_cat + 7) // 8) * 8)
    tab_fused = jnp.zeros((Kcat_pad, H), jnp.float32)
    off = 0
    for tab in params["tables"]:
        n = int(tab.shape[0])
        tab_fused = tab_fused.at[off:off + n, :].set(tab.astype(jnp.float32))
        off += n

    # Linear weight, bf16 (resident, loaded once).
    w_bf = params["w"].astype(jnp.bfloat16)                               # (E, H)

    # Semantic rows: bf16 stream, no lane padding; row padding only if needed.
    sem_rows = semantic_embeds.reshape(R, E).astype(jnp.bfloat16)
    if Rp > R:
        sem_rows = jnp.pad(sem_rows, ((0, Rp - R), (0, 0)))               # (Rp, E)

    # Raw category indices (offsets are baked into the kernel).  Padded rows get -1,
    # which the in-kernel validity mask turns into a zero contribution.
    idx = categories.reshape(R, C).astype(jnp.int32)
    if Rp > R:
        idx = jnp.pad(idx, ((0, Rp - R), (0, 0)), constant_values=-1)     # (Rp, C)

    # pe + bias folded ONCE into a single (TR, H) tile; resident across all blocks
    # because TR is a multiple of S, so block-local row p maps to position p % S.
    pe_pb = params["pe"][:S] + params["b"][None, :]                       # (S, H)
    peb_tile = jnp.tile(pe_pb, (TR // S, 1)).astype(jnp.float32)          # (TR, H)

    kernel = _make_kernel(cat_nums, Kcat_pad)

    flops = 2 * Rp * E * H + 2 * Rp * Kcat_pad * H + 2 * Rp * H
    bytes_accessed = (
        2 * Rp * E          # semantic rows (bf16)
        + 4 * Rp * C        # category indices (i32)
        + 2 * E * H         # linear weight (bf16, once)
        + 4 * Kcat_pad * H  # fused tables (f32, once)
        + 4 * TR * H        # pe + bias tile (f32, once)
        + 4 * Rp * H        # output (f32)
    )

    out = pl.pallas_call(
        kernel,
        grid=(n_blocks,),
        in_specs=[
            pl.BlockSpec((TR, E), lambda i: (i, 0)),          # semantic rows (streamed)
            pl.BlockSpec((TR, C), lambda i: (i, 0)),          # category indices (streamed)
            pl.BlockSpec((E, H), lambda i: (0, 0)),           # linear weight (resident)
            pl.BlockSpec((Kcat_pad, H), lambda i: (0, 0)),    # fused tables (resident)
            pl.BlockSpec((TR, H), lambda i: (0, 0)),          # pe + bias tile (resident)
        ],
        out_specs=pl.BlockSpec((TR, H), lambda i: (i, 0)),
        out_shape=jax.ShapeDtypeStruct((Rp, H), jnp.float32),
        compiler_params=pltpu.CompilerParams(dimension_semantics=("parallel",)),
        cost_estimate=pl.CostEstimate(
            flops=flops, transcendentals=0, bytes_accessed=bytes_accessed
        ),
    )(sem_rows, idx, w_bf, tab_fused, peb_tile)

    return out[:R].reshape(B, S, H)


def reference_forward(segments, semantic_embeds, categories, params):
    """Plain-JAX (f32) reference mirroring the PyTorch forward."""
    S = segments.shape[1]
    x = semantic_embeds @ params["w"] + params["b"]
    x = x + params["pe"][:S][None]
    for j, tab in enumerate(params["tables"]):
        x = x + tab[categories[..., j]]
    return x


if __name__ == "__main__":
    # ModelConfig (synthetic): use_df=False, hidden=32, embed_len=32,
    # num_categories=[5, 7], positional=True, dropout=0.1 (eval -> identity).
    B, S = 2, 8
    embed_len = 32
    embed_hidden = 32
    num_categories = (5, 7)

    key = jax.random.PRNGKey(0)
    k_w, k_b, k_sem, k_cat0, k_cat1, k_t0, k_t1 = jax.random.split(key, 7)

    params = {
        # Linear(embed_len, embed_hidden): weight stored as (E, H) (i.e. W.T).
        "w": jax.random.normal(k_w, (embed_len, embed_hidden), jnp.float32) * 0.1,
        "b": jax.random.normal(k_b, (embed_hidden,), jnp.float32) * 0.1,
        # Embedding tables (cat_num, embed_hidden).
        "tables": [
            jax.random.normal(k_t0, (num_categories[0], embed_hidden), jnp.float32) * 0.1,
            jax.random.normal(k_t1, (num_categories[1], embed_hidden), jnp.float32) * 0.1,
        ],
        # Positional embedding buffer (max_len, embed_hidden).
        "pe": make_positional_embedding(embed_hidden, max_len=256),
    }

    segments = jnp.zeros((B, S), jnp.int32)  # only the seq length is used
    semantic_embeds = jax.random.normal(k_sem, (B, S, embed_len), jnp.float32)
    categories = jnp.stack(
        [
            jax.random.randint(k_cat0, (B, S), 0, num_categories[0]),
            jax.random.randint(k_cat1, (B, S), 0, num_categories[1]),
        ],
        axis=-1,
    ).astype(jnp.int32)                      # (B, S, 2)

    out = input_embedding_forward(segments, semantic_embeds, categories, params)
    out = jax.block_until_ready(out)

    ref = reference_forward(segments, semantic_embeds, categories, params)
    assert out.shape == (B, S, embed_hidden) and out.dtype == jnp.float32
    # Tolerance deliberately loosened vs. the f32 reference: the semantic rows and
    # the linear weight are streamed in bf16 (f32 accumulation in the MXU).
    assert jnp.allclose(out, ref, atol=2e-2, rtol=2e-2), "mismatch vs reference"

    print("KERNEL_OK")
</pallas_src>

<mosaic_0001>
module attributes {stable_mosaic.version = 11 : i64} {
  func.func @kernel(%arg0: i32, %arg1: memref<8x32xbf16, #tpu.memory_space<vmem>>, %arg2: memref<8x2xi32, #tpu.memory_space<vmem>>, %arg3: memref<32x32xbf16, #tpu.memory_space<vmem>>, %arg4: memref<16x32xf32, #tpu.memory_space<vmem>>, %arg5: memref<8x32xf32, #tpu.memory_space<vmem>>, %arg6: memref<8x32xf32, #tpu.memory_space<vmem>>) attributes {dimension_semantics = [#tpu.dimension_semantics<parallel>], iteration_bounds = array<i64: 2>, scalar_prefetch = 0 : i64, scratch_operands = 0 : i64, tpu.core_type = #tpu.core_type<tc>, window_params = [{transform_indices = @transform_0, window_bounds = array<i64: 8, 32>}, {transform_indices = @transform_1, window_bounds = array<i64: 8, 2>}, {pipeline_mode = #tpu.pipeline_mode<synchronous>, transform_indices = @transform_2, window_bounds = array<i64: 32, 32>}, {pipeline_mode = #tpu.pipeline_mode<synchronous>, transform_indices = @transform_3, window_bounds = array<i64: 16, 32>}, {pipeline_mode = #tpu.pipeline_mode<synchronous>, transform_indices = @transform_4, window_bounds = array<i64: 8, 32>}, {transform_indices = @transform_5, window_bounds = array<i64: 8, 32>}]} {
    %c0 = arith.constant 0 : index
    %c0_0 = arith.constant 0 : index
    %0 = vector.load %arg1[%c0, %c0_0] : memref<8x32xbf16, #tpu.memory_space<vmem>>, vector<8x32xbf16>
    %c0_1 = arith.constant 0 : index
    %c0_2 = arith.constant 0 : index
    %1 = vector.load %arg3[%c0_1, %c0_2] : memref<32x32xbf16, #tpu.memory_space<vmem>>, vector<32x32xbf16>
    %cst = arith.constant dense<0.000000e+00> : vector<8x32xf32>
    %2 = tpu.matmul %0, %1, %cst {dimension_numbers = #tpu.dot_dimension_numbers<[1], [0], [0], [1], [0, 0, 1, 1], [], []>} : vector<8x32xbf16>, vector<32x32xbf16>, vector<8x32xf32> -> vector<8x32xf32>
    %c0_3 = arith.constant 0 : index
    %c0_4 = arith.constant 0 : index
    %3 = vector.load %arg2[%c0_3, %c0_4] : memref<8x2xi32, #tpu.memory_space<vmem>>, vector<8x2xi32>
    %4 = tpu.iota {dimensions = array<i32: 1>} : vector<8x16xi32>
    %cst_5 = arith.constant 0.000000e+00 : f32
    %5 = vector.broadcast %cst_5 : f32 to vector<8x16xf32>
    %6 = vector.extract_strided_slice %3 {offsets = [0, 0], sizes = [8, 1], strides = [1, 1]} : vector<8x2xi32> to vector<8x1xi32>
    %c0_i32 = arith.constant 0 : i32
    %7 = vector.broadcast %c0_i32 : i32 to vector<8x1xi32>
    %8 = arith.cmpi sge, %6, %7 : vector<8x1xi32>
    %c5_i32 = arith.constant 5 : i32
    %9 = vector.broadcast %c5_i32 : i32 to vector<8x1xi32>
    %10 = arith.cmpi slt, %6, %9 : vector<8x1xi32>
    %11 = arith.andi %8, %10 : vector<8x1xi1>
    %c0_i32_6 = arith.constant 0 : i32
    %12 = vector.broadcast %c0_i32_6 : i32 to vector<8x1xi32>
    %13 = arith.addi %6, %12 : vector<8x1xi32>
    %14 = vector.broadcast %13 : vector<8x1xi32> to vector<8x16xi32>
    %15 = arith.cmpi eq, %4, %14 : vector<8x16xi32>
    %16 = vector.broadcast %11 : vector<8x1xi1> to vector<8x16xi1>
    %17 = arith.andi %16, %15 : vector<8x16xi1>
    %18 = arith.extui %17 : vector<8x16xi1> to vector<8x16xi32>
    %19 = arith.sitofp %18 : vector<8x16xi32> to vector<8x16xf32>
    %20 = arith.addf %5, %19 : vector<8x16xf32>
    %21 = vector.extract_strided_slice %3 {offsets = [0, 1], sizes = [8, 1], strides = [1, 1]} : vector<8x2xi32> to vector<8x1xi32>
    %c0_i32_7 = arith.constant 0 : i32
    %22 = vector.broadcast %c0_i32_7 : i32 to vector<8x1xi32>
    %23 = arith.cmpi sge, %21, %22 : vector<8x1xi32>
    %c7_i32 = arith.constant 7 : i32
    %24 = vector.broadcast %c7_i32 : i32 to vector<8x1xi32>
    %25 = arith.cmpi slt, %21, %24 : vector<8x1xi32>
    %26 = arith.andi %23, %25 : vector<8x1xi1>
    %c5_i32_8 = arith.constant 5 : i32
    %27 = vector.broadcast %c5_i32_8 : i32 to vector<8x1xi32>
    %28 = arith.addi %21, %27 : vector<8x1xi32>
    %29 = vector.broadcast %28 : vector<8x1xi32> to vector<8x16xi32>
    %30 = arith.cmpi eq, %4, %29 : vector<8x16xi32>
    %31 = vector.broadcast %26 : vector<8x1xi1> to vector<8x16xi1>
    %32 = arith.andi %31, %30 : vector<8x16xi1>
    %33 = arith.extui %32 : vector<8x16xi1> to vector<8x16xi32>
    %34 = arith.sitofp %33 : vector<8x16xi32> to vector<8x16xf32>
    %35 = arith.addf %20, %34 : vector<8x16xf32>
    %c0_9 = arith.constant 0 : index
    %c0_10 = arith.constant 0 : index
    %36 = vector.load %arg4[%c0_9, %c0_10] : memref<16x32xf32, #tpu.memory_space<vmem>>, vector<16x32xf32>
    %cst_11 = arith.constant dense<0.000000e+00> : vector<8x32xf32>
    %37 = tpu.matmul %35, %36, %cst_11 {dimension_numbers = #tpu.dot_dimension_numbers<[1], [0], [0], [1], [0, 0, 1, 1], [], []>} : vector<8x16xf32>, vector<16x32xf32>, vector<8x32xf32> -> vector<8x32xf32>
    %38 = arith.addf %2, %37 : vector<8x32xf32>
    %c0_12 = arith.constant 0 : index
    %c0_13 = arith.constant 0 : index
    %39 = vector.load %arg5[%c0_12, %c0_13] : memref<8x32xf32, #tpu.memory_space<vmem>>, vector<8x32xf32>
    %40 = arith.addf %38, %39 : vector<8x32xf32>
    %c0_14 = arith.constant 0 : index
    %c0_15 = arith.constant 0 : index
    %41 = vector.load %arg6[%c0_14, %c0_15] : memref<8x32xf32, #tpu.memory_space<vmem>>, vector<8x32xf32>
    tpu.vector_store %arg6[%c0_14, %c0_15], %40 {strides = array<i32>} : memref<8x32xf32, #tpu.memory_space<vmem>>, vector<8x32xf32>,
    return
  }
  func.func @transform_0(%arg0: i32) -> (i32, i32) {
    %c0_i32 = arith.constant 0 : i32
    %c0_i32_0 = arith.constant 0 : i32
    return %arg0, %c0_i32 : i32, i32
  }
  func.func @transform_1(%arg0: i32) -> (i32, i32) {
    %c0_i32 = arith.constant 0 : i32
    %c0_i32_0 = arith.constant 0 : i32
    return %arg0, %c0_i32 : i32, i32
  }
  func.func @transform_2(%arg0: i32) -> (i32, i32) {
    %c0_i32 = arith.constant 0 : i32
    %c0_i32_0 = arith.constant 0 : i32
    %c0_i32_1 = arith.constant 0 : i32
    return %c0_i32, %c0_i32_0 : i32, i32
  }
  func.func @transform_3(%arg0: i32) -> (i32, i32) {
    %c0_i32 = arith.constant 0 : i32
    %c0_i32_0 = arith.constant 0 : i32
    %c0_i32_1 = arith.constant 0 : i32
    return %c0_i32, %c0_i32_0 : i32, i32
  }
  func.func @transform_4(%arg0: i32) -> (i32, i32) {
    %c0_i32 = arith.constant 0 : i32
    %c0_i32_0 = arith.constant 0 : i32
    %c0_i32_1 = arith.constant 0 : i32
    return %c0_i32, %c0_i32_0 : i32, i32
  }
  func.func @transform_5(%arg0: i32) -> (i32, i32) {
    %c0_i32 = arith.constant 0 : i32
    %c0_i32_0 = arith.constant 0 : i32
    return %arg0, %c0_i32 : i32, i32
  }
}

</mosaic_0001>

<bundles_post_ra>
// kernel: tpu_custom_call.1
= control target key start
LH: loop header
LB: loop body
LE: loop exit
PB: predicated region body
PF: predicated region fallthrough
CT: control target
= control target key end

     0   :  { %10 = vsyncpa [#allocation3], 0  ;;  %s973_s0 = inlined_call_operand.hbm [shape: bf16[16,32], index: 0, kind: input, shape index: {}]   ;;  %s974_s1 = inlined_call_operand.vmem [shape: s32[16,2], index: 1, kind: input, shape index: {}]   ;;  %s975_s2 = inlined_call_operand.vmem [shape: bf16[32,32], index: 2, kind: input, shape index: {}]   ;;  %s976_s3 = inlined_call_operand.hbm [shape: f32[16,32], index: 3, kind: input, shape index: {}]   ;;  %s977_s4 = inlined_call_operand.hbm [shape: f32[8,32], index: 4, kind: input, shape index: {}]   ;;  %s978_s5 = inlined_call_operand.hbm [shape: f32[16,32], index: 5, kind: output, shape index: {}]  }
   0x1   :  { %12 = vsyncpa [#allocation3 + $0x1], 0 }
   0x2   :  { %13 = vsyncpa [#allocation6], 0 }
   0x3   :  { %14 = vsyncpa [#allocation4], 0 }
   0x4   :  { %16 = vsyncpa [#allocation4 + $0x1], 0  ;;  %s811_s18 = smov 0   ;;  %s813_s19 = smov 0  }
   0x5   :  { %s815_s20 = smov 0   ;;  %s817_s21 = smov 0  }
   0x6 LB: > { %s182_s24 = sshll.u32 %s976_s3, 4  ;;  %s835_s25 = sadd.s32 4294967295, %s772_s21   ;;  %s772_s21 = sphi %s817_s21, %s989_s21   ;;  %s768_s20 = sphi %s815_s20, %s988_s20   ;;  %s764_s19 = sphi %s813_s19, %s987_s19   ;;  %s760_s18 = sphi %s811_s18, %s986_s18   ;;  %s183_s24 = int_to_ptr.hbm [resolvable:$true] %s182_s24 }
   0x7   : > { %p507_p0 = scmp.ge.s32.totalorder %s772_s21, 1  ;;  %p43_p1 = scmp.eq.s32.totalorder %s835_s25, 0 }
   0x8   : > { %p168_p2 = scmp.lt.s32.totalorder %s772_s21, 3  ;;  %s774_s27 = smov [#allocation5]  }
   0x9   : > { %s184_s28 = sshll.u32 %s774_s27, 4  ;;  %s197_s6 = sshll.u32 %s977_s4, 4  ;;  %s185_s28 = int_to_ptr.vmem [resolvable:$true] %s184_s28  ;;  %s198_s6 = int_to_ptr.hbm [resolvable:$true] %s197_s6 }
   0xa   : > { %p840_p3 = pnand %p507_p0, %p168_p2  ;;  %s775_s7 = smov [#allocation7]  }
   0xb   : > { %s199_s8 = sshll.u32 %s775_s7, 4  ;;  %s776_s9 = smov 128   ;;  %s200_s8 = int_to_ptr.vmem [resolvable:$true] %s199_s8 }
   0xc   : > { %p549_p4 = pneg %p840_p3  ;;  %s777_s10 = smov 8  }
   0xd   : > { %s506_s11 = sadd.s32 4294967294, %s772_s21   ;;  %s854_s12 = sadd.s32 1, %s772_s21  }
   0xe   : > { %p550_p6 = pnand %p549_p4, %p43_p1  ;;  %s26_s13 = ssub.s32 %s772_s21, %s854_s12 }
   0xf   : > { %s29_s14 = sadd.s32 1, %s768_s20  ;;  %p27_p7 = scmp.eq.s32.totalorder %s26_s13, 0 }
  0x10   : > { %552 = dma.hbm_to_vmem [thread:$0]  (!%p550_p6), %s183_s24, 256, %s185_s28, [#allocation6], %s776_s9, %s776_s9, %s777_s10  }
  0x11   : > { %555 = dma.hbm_to_vmem [thread:$0]  (!%p550_p6), %s198_s6, 128, %s200_s8, [#allocation6]  }
  0x12   : > { %p36_p8 = scmp.ne.s32.totalorder %s768_s20, %s764_s19  ;;  %p37_p9 = scmp.eq.s32.totalorder %s772_s21, 0 }
  0x13   : > { %p42_p10 = scmp.ne.s32.totalorder %s764_s19, %s760_s18  ;;  %p155_p13 = scmp.eq.s32.totalorder %s835_s25, 1 }
  0x14   : > { %s865_s15 = scalar_select %p27_p7, %s768_s20, %s29_s14  }
  0x15   : > { %p867_p11 = por %p37_p9, %p36_p8  ;;  %p873_p12 = por %p43_p1, %p42_p10 }
  0x16   : > { %p161_p0 = scmp.eq.s32.totalorder %s506_s11, 1  ;;  %p566_p2 = scmp.lt.s32.totalorder %s772_s21, 2 }
  0x17   : > { %s210_s22 = sand.u32 1, %s768_s20   ;;  %p880_p4 = por %p155_p13, %p36_p8 }
  0x18   : > { %p884_p6 = por %p161_p0, %p42_p10  ;;  %s511_s27 = sshll.u32 %s210_s22, 2 }
  0x19   : > { %s512_s28 = sshll.u32 %s772_s21, 2  ;;  %s214_s7 = scalar_lea.vmem [#allocation2], %s511_s27 }
  0x1a   : > { %s218_s6 = scalar_lea.hbm %s973_s0, %s512_s28  ;;  %s222_s8 = sshll.u32 %s214_s7, 4  ;;  %s223_s8 = int_to_ptr.vmem [resolvable:$true] %s222_s8 }
  0x1b   : > { %s220_s9 = sshll.u32 %s218_s6, 4  ;;  %p894_p7 = pnand %p566_p2, %p867_p11  ;;  %s221_s9 = int_to_ptr.hbm [resolvable:$true] %s220_s9 }
  0x1c   : > { %s211_s11 = scalar_lea.sflag [#allocation3], %s210_s22  ;;  %s672_s13 = sshra.s32 %s221_s9, 4  ;;  %s673_s13 = int_to_ptr.hbm [resolvable:$true] %s672_s13 }
  0x1d   : > { %s674_s14 = scalar_lea.hbm %s673_s13, 4  ;;  %p676_p9 = pneg %p894_p7 }
  0x1e   : > { %p675_p8 = scmp.ne.s32.totalorder %s673_s13, %s674_s14  ;;  %s679_s29 = scalar_lea.hbm %s973_s0, 8 }
  0x1f   : > { %p680_p11 = scmp.lt.s32.totalorder %s673_s13, %s973_s0  ;;  %p681_p0 = scmp.lt.s32.totalorder %s679_s29, %s674_s14 }
  0x20   : > { %p677_p10 = pnand %p676_p9, %p675_p8 }
  0x21   : > { %p682_p2 = por %p681_p0, %p680_p11 }
  0x22   : > { %p678_p13 = pneg %p677_p10 }
  0x24   : > { %p683_p5 = pnand %p682_p2, %p678_p13 }
  0x26   : > { %686 = shalt.err (!%p683_p5)
}
  0x27   : > { %559 = dma.hbm_to_vmem [thread:$0]  (!%p894_p7), %s221_s9, 64, %s223_s8, %s211_s11  }
  0x28   : > { %238 = sbr.rel (%p840_p3) target bundleno = 318 (0x13e), region = 40  ;;  %s911_s22 = sand.u32 (!%p840_p3), 1, %s764_s19  }
  0x29   : > { %s514_s6 = sshll.u32 (!%p840_p3), %s911_s22, 2  ;;  %s241_s7 = scalar_lea.sflag (!%p840_p3), [#allocation3], %s911_s22 }
  0x2a   : > { %s915_s27 = scalar_lea.vmem (!%p840_p3), [#allocation2], %s514_s6 }
  0x2d   : > { %747 = dma.done.wait (%p873_p12), %s241_s7, 64  }
  0x2e   : > { %749 = vsyncadd (%p873_p12), %s241_s7, 4294967232 }
  0x2f   : > { %751 = dma.done.wait (%p43_p1), [#allocation6], 384  }
  0x30   : > { %753 = vsyncadd (%p43_p1), [#allocation6], 4294966912  ;;  %p286_p3 = scmp.lt.s32.totalorder %s835_s25, 1  ;;  %v778_v0 = vmov 0   ;;  %v779_v1 = vmov 1   ;;  %v536_v3 = vld [vmem:[%s975_s2 + $0x8] sm:$0xff]  ;;  %v297_v12 = vlaneseq }
  0x31   : > { %609 = vset.pattern.permute.xlu0 %v778_v0  ;;  %610 = vset.pattern.permute.xlu1 %v779_v1  ;;  %v535_v7 = vld [vmem:[%s975_s2] sm:$0xff]  ;;  %vm369_vm5 = vcmask 261120   ;;  %v332_v9 = vld [vmem:[#allocation5 + $0x8] sm:$0xff]  ;;  %v331_v10 = vld [vmem:[#allocation5] sm:$0xff]  ;;  %v780_v17 = vmov 0.0   ;;  %vm333_vm12 = vcmask 130048  }
  0x32   : > { %s287_s26 = scalar_select %p286_p3, %s835_s25, 1  ;;  %379 = vmatpush.bf16.msra.mxu1 %v536_v3  ;;  %v291_v8 = vld [vmem:[%s915_s27] sm:$0xf]  ;;  %351 = vmatpush.msra.mxu0 %v332_v9  ;;  %v298_v14 = vand.u32 127, %v297_v12  ;;  %v386_v24 = vld [vmem:[#allocation7] sm:$0xff] }
  0x33   : > { %s517_s29 = sshll.u32 %s911_s22, 3  ;;  %s532_s30 = sshll.u32 %s835_s25, 3 }
  0x34   : > { %s518_s8 = sshll.u32 %s287_s26, 3  ;;  %352 = vmatpush.msra.mxu0 %v331_v10  ;;  %s400_s7 = scalar_lea.hbm %s978_s5, %s532_s30 }
  0x35   : > { %s289_s17 = scalar_lea.vmem %s974_s1, %s518_s8  ;;  %s285_s27 = scalar_lea.vmem [#allocation8], %s517_s29 }
  0x36   : > { %v296_v2 = vld [vmem:[%s289_s17] sm:$0xff]  ;;  %380 = vmatpush.bf16.msra.mxu1 %v535_v7  ;;  %s402_s26 = sshll.u32 %s285_s27, 4  ;;  %s404_s8 = sshll.u32 %s400_s7, 4  ;;  %s403_s26 = int_to_ptr.vmem [resolvable:$true] %s402_s26  ;;  %s405_s8 = int_to_ptr.hbm [resolvable:$true] %s404_s8 }
  0x37   : > { %303 = vperm.xlu0 %609, %v296_v2   ;;  %v317_v4 = vadd.s32 5, %v296_v2  ;;  %vm299_vm0 = vcmp.ge.s32.totalorder %v296_v2, 0  ;;  %vm300_vm1 = vcmp.lt.s32.totalorder %v296_v2, 5  ;;  %vm315_vm2 = vcmp.lt.s32.totalorder %v296_v2, 7  ;;  %s390_s9 = scalar_lea.sflag [#allocation4], %s911_s22  ;;  %s716_s10 = sshra.s32 %s405_s8, 4  ;;  %s717_s10 = int_to_ptr.hbm [resolvable:$true] %s716_s10 }
  0x38   : > { %vm301_vm3 = vmand %vm299_vm0, %vm300_vm1  ;;  %s718_s25 = scalar_lea.hbm %s717_s10, 8  ;;  %s722_s13 = scalar_lea.hbm %s978_s5, 16 }
  0x39   : > { %319 = vperm.xlu1 %610, %v317_v4   ;;  %vm316_vm4 = vmand %vm299_vm0, %vm315_vm2  ;;  %v306_v5 = vsel %vm301_vm3, 1, %v778_v0  ;;  %530 = vmatmul.msk.bf16.vlgmr.msra.gmra.mxu1 %vm369_vm5, %v291_v8  ;;  %p719_p1 = scmp.ne.s32.totalorder %s717_s10, %s718_s25  ;;  %p723_p7 = scmp.lt.s32.totalorder %s717_s10, %s978_s5 }
  0x3a   : > { %v322_v6 = vsel %vm316_vm4, 1, %v778_v0  ;;  %p724_p8 = scmp.lt.s32.totalorder %s722_s13, %s718_s25 }
  0x3b   : > { %p720_p5 = pnand %p719_p1, %p880_p4 }
  0x3c   : > { %p725_p9 = por %p724_p8, %p723_p7 }
  0x3d   : > { %p721_p12 = pneg %p720_p5 }
  0x3f   : > { %308 = vperm.xlu0 %609, %v306_v5   ;;  %p726_p10 = pnand %p725_p9, %p721_p12 }
  0x41   : > { %324 = vperm.xlu1 %610, %v322_v6  }
  0x47   : > { %611 = vset.pattern.permute.xlu0 %v779_v1 }
  0xa9   : > { %v304_v11 = vpop.permute.xlu0 %303 }
  0xaa   : > { %vm305_vm6 = vcmp.eq.s32.totalorder %v298_v14, %v304_v11 }
  0xab   : > { %v320_v13 = vpop.permute.xlu1 %319 }
  0xac   : > { %vm321_vm9 = vcmp.eq.s32.totalorder %v298_v14, %v320_v13 }
  0xb1   : > { %v309_v15 = vpop.permute.xlu0 %308 }
  0xb2   : > { %vm310_vm7 = vcmp.eq.s32.totalorder %v309_v15, 1 }
  0xb3   : > { %vm311_vm8 = vmand %vm310_vm7, %vm305_vm6  ;;  %v325_v16 = vpop.permute.xlu1 %324 }
  0xb4   : > { %vm326_vm10 = vcmp.eq.s32.totalorder %v325_v16, 1  ;;  %v519_v18 = vsel %vm311_vm8, 1.0, %v780_v17 }
  0xb5   : > { %vm327_vm11 = vmand %vm326_vm10, %vm321_vm9 }
  0xb6   : > { %v520_v19 = vsel %vm327_vm11, 1.0, %v780_v17  ;;  %v382_v21 = vpop.f32.mrf.mxu1 }
  0xb7   : > { %v330_v20 = vadd.f32 %v520_v19, %v519_v18 }
  0xb9   : > { %521 = vmatmul.msk.f32.vlgmr.msra.gmra.mxu0 %vm333_vm12, %v330_v20 }
  0xbe   : > { %v384_v22 = vpop.f32.mrf.mxu1 }
 0x136   : > { %v354_v23 = vpop.f32.mrf.mxu0 }
 0x137   : > { %v383_v25 = vadd.f32 %v382_v21, %v354_v23 }
 0x139   : > { %v387_v26 = vadd.f32 %v386_v24, %v383_v25 }
 0x13b   : > { %388 = vst.msk [vmem:[%s285_s27] sm:$0xff] %vm369_vm5, %v387_v26 }
 0x13c   : > { %729 = shalt.err (!%p726_p10)
}
 0x13d   : > { %547 = dma.vmem_to_hbm [thread:$0]  (%p880_p4), %s403_s26, 128, %s405_s8, %s390_s9  }
 0x13e PF: > { %s416_s22 = sand.u32 1, %s760_s18   ;;  %p985_p13 = scmp.ge.s32.totalorder %s772_s21, 2 }
 0x13f   : > { %s417_s29 = scalar_lea.sflag [#allocation4], %s416_s22 }
 0x140   : > { %p561_p11 = pnand %p985_p13, %p884_p6 }
 0x142   : > { %p562_p0 = pneg %p561_p11 }
 0x144   : > { %755 = dma.done.wait (%p562_p0), %s417_s29, 128  }
 0x145   : > { %757 = vsyncadd (%p562_p0), %s417_s29, 4294967168  ;;  %p19_p2 = scmp.ge.s32.totalorder %s854_s12, 4   ;;  %s986_s18 = smov %s764_s19 }
 0x146   : > { %s987_s19 = smov %s768_s20  ;;  %s988_s20 = smov %s865_s15 }
 0x147   : > { %s989_s21 = smov %s854_s12  ;;  %21 = sbr.rel (!%p19_p2) target bundleno = 6 (0x6), region = 96 }
 0x14c   :  { %423 = vsyncpa [#allocation3], 1 }
 0x14d   :  { %425 = vsyncpa [#allocation3 + $0x1], 1 }
 0x14e   :  { %426 = vsyncpa [#allocation6], 1 }
 0x14f   :  { %427 = vsyncpa [#allocation4], 1 }
 0x150   :  { %429 = vsyncpa [#allocation4 + $0x1], 1 }

</bundles_post_ra>
